<compile_context>
chip_gen: v7x
topology: tpu7x:2x2x1
jax: 0.10.0
libtpu: 0.0.40
codegen_flags: <defaults>
</compile_context>

<pallas_src>
import jax
import jax.numpy as jnp
from jax.experimental import pallas as pl
from jax.experimental.pallas import tpu as pltpu

_MIB = 1024 * 1024


# --------------------------------------------------------------------------- #
# Helpers
# --------------------------------------------------------------------------- #
def _round_up(x, m):
    return ((x + m - 1) // m) * m


def _vmem_budget_bytes():
    """Generation-aware scoped-VMEM budget (leaves headroom below physical)."""
    cap = 0
    try:
        cap = int(getattr(pltpu.get_tpu_info(), "vmem_capacity_bytes", 0) or 0)
    except Exception:
        cap = 0
    if cap <= 0:
        return 48 * _MIB                 # conservative fallback (fits v7x's 64 MiB)
    if cap >= 128 * _MIB:                # v5e / v6e: 128 MiB physical
        return 100 * _MIB
    return (cap * 7) // 8                # v7x: 64 MiB -> ~56 MiB


def _divisor_tiles(n, step):
    """Divisors of n that are multiples of `step` (plus n itself), descending."""
    tiles = {n}
    tiles.update(d for d in range(step, n + 1, step) if n % d == 0)
    return sorted(tiles, reverse=True)


def _spec(block_shape, index_map, *, buffers=None):
    """BlockSpec, optionally requesting an explicit buffer count."""
    if buffers is not None and hasattr(pl, "Buffered"):
        try:
            return pl.BlockSpec(block_shape, index_map,
                                pipeline_mode=pl.Buffered(buffers))
        except TypeError:
            pass
    return pl.BlockSpec(block_shape, index_map)


def _run_with_fallback(run, single_buffer_constants):
    """Try single-buffered constants first; fall back to default buffering."""
    if single_buffer_constants:
        try:
            return run(True)
        except Exception:
            pass
    return run(False)


def _pad_operands(seq, adj, weight_t, bias, n_p, k_p, f_p, compute_dtype):
    B, N, in_ft = seq.shape
    out_ft = weight_t.shape[1]
    pn, pk, pf = n_p - N, k_p - in_ft, f_p - out_ft
    seq_c = seq if not (pn or pk) else jnp.pad(seq, ((0, 0), (0, pn), (0, pk)))
    adj_c = adj if not pn else jnp.pad(adj, ((0, 0), (0, pn), (0, pn)))
    w_c = weight_t if not (pk or pf) else jnp.pad(weight_t, ((0, pk), (0, pf)))
    b2 = bias.reshape(1, -1)
    b_c = b2 if not pf else jnp.pad(b2, ((0, 0), (0, pf)))
    return (seq_c.astype(compute_dtype), adj_c.astype(compute_dtype),
            w_c.astype(compute_dtype), b_c.astype(jnp.float32))


# --------------------------------------------------------------------------- #
# Kernels
# --------------------------------------------------------------------------- #
def _gcn_fused_kernel(alpha_ref, seq_ref, adj_ref, w_ref, bias_ref, out_ref,
                      fts_ref):
    # alpha_ref: (1,) f32 SMEM        PReLU slope
    # seq_ref:   (1, N_p, K_p)        VMEM (batch-constant, single-buffered)
    # adj_ref:   (1, tm, N_p)         VMEM
    # w_ref:     (K_p, F_p)           VMEM (grid-constant)
    # bias_ref:  (1, F_p) f32         VMEM
    # out_ref:   (1, tm, F_p)         VMEM (lane-dense, unmasked stores)
    # fts_ref:   (N_p, F_p)           VMEM scratch (projected features per batch)
    r = pl.program_id(1)

    # Feature projection once per batch element; row tiles reuse the scratch.
    @pl.when(r == 0)
    def _():
        fts = jnp.dot(seq_ref[0], w_ref[...],
                      preferred_element_type=jnp.float32)
        fts_ref[...] = fts.astype(fts_ref.dtype)

    # Graph aggregation for this row tile: (tm, N_p) @ (N_p, F_p), f32 accum.
    agg = jnp.dot(adj_ref[0], fts_ref[...], preferred_element_type=jnp.float32)

    # Fused epilogue: bias add + PReLU in one VPU pass.
    a = alpha_ref[0]
    x = agg + bias_ref[...]
    out_ref[0] = jnp.where(x > 0, x, a * x).astype(out_ref.dtype)


def _gcn_agg_kernel(alpha_ref, adj_ref, fts_ref, bias_ref, out_ref, acc_ref):
    # alpha_ref: (1,) f32 SMEM
    # adj_ref:   (1, tm, tk)     VMEM
    # fts_ref:   (1, tk, F_p)    VMEM (precomputed bf16 projected features)
    # bias_ref:  (1, F_p) f32    VMEM
    # out_ref:   (1, tm, F_p)    VMEM
    # acc_ref:   (tm, F_p) f32   VMEM accumulator (carried over the K axis)
    k = pl.program_id(2)

    @pl.when(k == 0)
    def _():
        acc_ref[...] = jnp.zeros_like(acc_ref)

    acc_ref[...] += jnp.dot(adj_ref[0], fts_ref[0],
                            preferred_element_type=jnp.float32)

    @pl.when(k == pl.num_programs(2) - 1)
    def _():
        a = alpha_ref[0]
        x = acc_ref[...] + bias_ref[...]
        out_ref[0] = jnp.where(x > 0, x, a * x).astype(out_ref.dtype)


# --------------------------------------------------------------------------- #
# Wrapper
# --------------------------------------------------------------------------- #
def gcn_forward(seq, adj, weight_t, bias, prelu_alpha, *,
                compute_dtype=jnp.bfloat16, row_tile=None,
                force_two_pass=False, single_buffer_constants=True,
                return_padded=False):
    """GCN forward: PReLU(adj @ (seq @ W) + bias).

    seq: (B, N, in_ft), adj: (B, N, N), weight_t: (in_ft, out_ft) (transposed
    nn.Linear weight), bias: (out_ft,), prelu_alpha: (1,).
    Pass compute_dtype=jnp.float32 for exact f32 parity with the PyTorch module.
    """
    B, N, in_ft = seq.shape
    assert adj.shape == (B, N, N)
    assert weight_t.shape[0] == in_ft
    out_ft = weight_t.shape[1]
    out_dtype = seq.dtype

    budget = _vmem_budget_bytes()
    headroom = 2 * _MIB
    cbytes = jnp.dtype(compute_dtype).itemsize
    obytes = jnp.dtype(out_dtype).itemsize

    F = _round_up(out_ft, 128)      # lane-dense output columns
    Kf = _round_up(in_ft, 128)      # MXU-aligned projection K dim
    alpha_c = prelu_alpha.reshape(-1).astype(jnp.float32)

    def fused_bytes(n_p, tm):
        return (n_p * Kf * cbytes          # seq (single-buffered, batch-const)
                + Kf * F * cbytes          # W   (single-buffered, grid-const)
                + F * 4                    # bias
                + n_p * F * cbytes         # fts scratch
                + 2 * tm * n_p * cbytes    # adj tile (double-buffered)
                + 2 * tm * F * obytes)     # out tile (double-buffered)

    N16 = _round_up(max(N, 16), 16)
    use_two_pass = (force_two_pass
                    or fused_bytes(N16, 16) > budget - headroom
                    or (B == 1 and N16 >= 256))

    if not use_two_pass:
        # ---------------- fused path: projection scratch + row-tiled agg ------
        N_p = N16
        seq_c, adj_c, w_c, b_c = _pad_operands(seq, adj, weight_t, bias,
                                               N_p, Kf, F, compute_dtype)
        if row_tile is None:
            row_tile = 16
            for tm in _divisor_tiles(N_p, 16):
                if fused_bytes(N_p, tm) <= budget - headroom:
                    row_tile = tm
                    break
        assert N_p % row_tile == 0, "row_tile must divide the padded node count"

        def run(single_buf):
            bufs = 1 if single_buf else None
            grid_spec = pltpu.PrefetchScalarGridSpec(
                num_scalar_prefetch=0,
                grid=(B, N_p // row_tile),
                in_specs=[
                    pl.BlockSpec(memory_space=pltpu.SMEM),                      # alpha
                    _spec((1, N_p, Kf), lambda b, r: (b, 0, 0), buffers=bufs),  # seq
                    pl.BlockSpec((1, row_tile, N_p), lambda b, r: (b, r, 0)),   # adj
                    _spec((Kf, F), lambda b, r: (0, 0), buffers=bufs),          # W
                    _spec((1, F), lambda b, r: (0, 0), buffers=bufs),           # bias
                ],
                out_specs=pl.BlockSpec((1, row_tile, F), lambda b, r: (b, r, 0)),
                scratch_shapes=[pltpu.VMEM((N_p, F), compute_dtype)],
            )
            return pl.pallas_call(
                _gcn_fused_kernel,
                out_shape=jax.ShapeDtypeStruct((B, N_p, F), out_dtype),
                grid_spec=grid_spec,
                # Row-tile axis carries the fts scratch -> must stay "arbitrary";
                # batch axis is megacore-parallel.
                compiler_params=pltpu.CompilerParams(
                    dimension_semantics=("parallel", "arbitrary"),
                    vmem_limit_bytes=budget),
            )(alpha_c, seq_c, adj_c, w_c, b_c)

        out_p = _run_with_fallback(run, single_buffer_constants)

    else:
        # ---------------- two-pass path: XLA projection + K-tiled aggregation -
        N_p = _round_up(max(N, 128), 128)
        seq_c, adj_c, w_c, b_c = _pad_operands(seq, adj, weight_t, bias,
                                               N_p, Kf, F, compute_dtype)
        # Pass 1: projection (plain XLA batched matmul; fts traffic is O(N*F),
        # negligible vs. the O(N^2) adj stream).
        fts = jnp.einsum("bnk,kf->bnf", seq_c, w_c,
                         preferred_element_type=jnp.float32).astype(compute_dtype)

        def agg_bytes(t):
            return (2 * t * t * cbytes      # adj tile (double-buffered)
                    + 2 * t * F * cbytes    # fts tile (double-buffered)
                    + F * 4                 # bias
                    + 2 * t * F * obytes    # out tile (double-buffered)
                    + t * F * 4)            # f32 accumulator
        tile = 128
        for t in _divisor_tiles(N_p, 128):
            if t > 1024:
                continue
            if agg_bytes(t) <= budget - headroom:
                tile = t
                break
        tm = tk = tile

        def run(single_buf):
            bufs = 1 if single_buf else None
            grid_spec = pltpu.PrefetchScalarGridSpec(
                num_scalar_prefetch=0,
                grid=(B, N_p // tm, N_p // tk),
                in_specs=[
                    pl.BlockSpec(memory_space=pltpu.SMEM),                       # alpha
                    pl.BlockSpec((1, tm, tk), lambda b, r, k: (b, r, k)),        # adj
                    pl.BlockSpec((1, tk, F), lambda b, r, k: (b, k, 0)),         # fts
                    _spec((1, F), lambda b, r, k: (0, 0), buffers=bufs),         # bias
                ],
                out_specs=pl.BlockSpec((1, tm, F), lambda b, r, k: (b, r, 0)),
                scratch_shapes=[pltpu.VMEM((tm, F), jnp.float32)],
            )
            return pl.pallas_call(
                _gcn_agg_kernel,
                out_shape=jax.ShapeDtypeStruct((B, N_p, F), out_dtype),
                grid_spec=grid_spec,
                # Batch AND row-tile axes are parallel (both v7x TensorCores are
                # usable even when B == 1); K axis carries the accumulator.
                compiler_params=pltpu.CompilerParams(
                    dimension_semantics=("parallel", "parallel", "arbitrary"),
                    vmem_limit_bytes=budget),
            )(alpha_c, adj_c, fts, b_c)

        out_p = _run_with_fallback(run, single_buffer_constants)

    if return_padded or (N_p == N and F == out_ft):
        return out_p
    # NOTE: this slice is an extra HBM copy; pass return_padded=True and slice
    # lazily downstream to avoid it when padding was applied.
    return out_p[:, :N, :out_ft]


# --------------------------------------------------------------------------- #
# Self-test
# --------------------------------------------------------------------------- #
if __name__ == "__main__":
    key = jax.random.PRNGKey(0)
    B, N, in_ft, out_ft = 2, 16, 32, 32

    k_seq, k_adj, k_w = jax.random.split(key, 3)
    seq = jax.random.normal(k_seq, (B, N, in_ft), dtype=jnp.float32)
    adj = jax.random.uniform(k_adj, (B, N, N), dtype=jnp.float32)

    # Parameters (deterministic init matching the module's __init__):
    #   nn.Linear weight: xavier_uniform_, shape (out_ft, in_ft); stored transposed.
    bound = (6.0 / (in_ft + out_ft)) ** 0.5
    weight = jax.random.uniform(k_w, (out_ft, in_ft), dtype=jnp.float32,
                                minval=-bound, maxval=bound)
    weight_t = weight.T                                   # (in_ft, out_ft)
    bias = jnp.zeros((out_ft,), dtype=jnp.float32)        # bias.data.fill_(0.0)
    prelu_alpha = jnp.array([0.25], dtype=jnp.float32)    # nn.PReLU default init

    # Pure-JAX reference mirroring the kernel's numerics (bf16 operands, f32 accum).
    seq_b = seq.astype(jnp.bfloat16)
    adj_b = adj.astype(jnp.bfloat16)
    w_b = weight_t.astype(jnp.bfloat16)
    fts_ref = jnp.einsum("bnk,kf->bnf", seq_b, w_b,
                         preferred_element_type=jnp.float32).astype(jnp.bfloat16)
    ref = jnp.einsum("bnm,bmf->bnf", adj_b, fts_ref,
                     preferred_element_type=jnp.float32) + bias
    ref = jnp.where(ref > 0, ref, 0.25 * ref)

    # Path 1: fused (per-batch projection scratch reused across row tiles).
    out_fused = jax.block_until_ready(
        gcn_forward(seq, adj, weight_t, bias, prelu_alpha))
    # Path 2: two-pass K-tiled aggregation (used for large N / B == 1).
    out_2pass = jax.block_until_ready(
        gcn_forward(seq, adj, weight_t, bias, prelu_alpha, force_two_pass=True))

    for out in (out_fused, out_2pass):
        assert out.shape == (B, N, out_ft)
        assert jnp.allclose(out, ref, atol=1e-2, rtol=1e-2), \
            float(jnp.max(jnp.abs(out - ref)))

    print("KERNEL_OK")
</pallas_src>

<mosaic_0001>
module attributes {stable_mosaic.version = 11 : i64} {
  func.func @_gcn_fused_kernel(%arg0: i32, %arg1: i32, %arg2: memref<1xf32, #tpu.memory_space<smem>>, %arg3: memref<1x16x128xbf16, #tpu.memory_space<vmem>>, %arg4: memref<1x16x16xbf16, #tpu.memory_space<vmem>>, %arg5: memref<128x128xbf16, #tpu.memory_space<vmem>>, %arg6: memref<1x128xf32, #tpu.memory_space<vmem>>, %arg7: memref<1x16x128xf32, #tpu.memory_space<vmem>>, %arg8: memref<16x128xbf16, #tpu.memory_space<vmem>>) attributes {dimension_semantics = [#tpu.dimension_semantics<parallel>, #tpu.dimension_semantics<arbitrary>], iteration_bounds = array<i64: 2, 1>, scalar_prefetch = 0 : i64, scratch_operands = 1 : i64, tpu.core_type = #tpu.core_type<tc>, window_params = [{transform_indices = @transform_0, window_bounds = array<i64: 1>}, {pipeline_mode = #tpu.pipeline_mode<synchronous>, transform_indices = @transform_1, window_bounds = array<i64: 1, 16, 128>}, {transform_indices = @transform_2, window_bounds = array<i64: 1, 16, 16>}, {pipeline_mode = #tpu.pipeline_mode<synchronous>, transform_indices = @transform_3, window_bounds = array<i64: 128, 128>}, {pipeline_mode = #tpu.pipeline_mode<synchronous>, transform_indices = @transform_4, window_bounds = array<i64: 1, 128>}, {transform_indices = @transform_5, window_bounds = array<i64: 1, 16, 128>}]} {
    %c0_i32 = arith.constant 0 : i32
    %0 = arith.cmpi eq, %arg1, %c0_i32 : i32
    %1 = arith.extui %0 : i1 to i32
    %c0_i32_0 = arith.constant 0 : i32
    %2 = arith.cmpi ne, %1, %c0_i32_0 : i32
    scf.if %2 {
      %c0_12 = arith.constant 0 : index
      %c0_13 = arith.constant 0 : index
      %c0_14 = arith.constant 0 : index
      %19 = vector.load %arg3[%c0_12, %c0_13, %c0_14] : memref<1x16x128xbf16, #tpu.memory_space<vmem>>, vector<1x16x128xbf16>
      %20 = vector.shape_cast %19 : vector<1x16x128xbf16> to vector<16x128xbf16>
      %c0_15 = arith.constant 0 : index
      %c0_16 = arith.constant 0 : index
      %21 = vector.load %arg5[%c0_15, %c0_16] : memref<128x128xbf16, #tpu.memory_space<vmem>>, vector<128x128xbf16>
      %cst_17 = arith.constant dense<0.000000e+00> : vector<16x128xf32>
      %22 = tpu.matmul %20, %21, %cst_17 {dimension_numbers = #tpu.dot_dimension_numbers<[1], [0], [0], [1], [0, 0, 1, 1], [], []>} : vector<16x128xbf16>, vector<128x128xbf16>, vector<16x128xf32> -> vector<16x128xf32>
      %23 = arith.truncf %22 : vector<16x128xf32> to vector<16x128xbf16>
      %c0_18 = arith.constant 0 : index
      %c0_19 = arith.constant 0 : index
      %24 = vector.load %arg8[%c0_18, %c0_19] : memref<16x128xbf16, #tpu.memory_space<vmem>>, vector<16x128xbf16>
      tpu.vector_store %arg8[%c0_18, %c0_19], %23 {strides = array<i32>} : memref<16x128xbf16, #tpu.memory_space<vmem>>, vector<16x128xbf16>,
    } else {
    }
    %c0 = arith.constant 0 : index
    %c0_1 = arith.constant 0 : index
    %c0_2 = arith.constant 0 : index
    %3 = vector.load %arg4[%c0, %c0_1, %c0_2] : memref<1x16x16xbf16, #tpu.memory_space<vmem>>, vector<1x16x16xbf16>
    %4 = vector.shape_cast %3 : vector<1x16x16xbf16> to vector<16x16xbf16>
    %c0_3 = arith.constant 0 : index
    %c0_4 = arith.constant 0 : index
    %5 = vector.load %arg8[%c0_3, %c0_4] : memref<16x128xbf16, #tpu.memory_space<vmem>>, vector<16x128xbf16>
    %cst = arith.constant dense<0.000000e+00> : vector<16x128xf32>
    %6 = tpu.matmul %4, %5, %cst {dimension_numbers = #tpu.dot_dimension_numbers<[1], [0], [0], [1], [0, 0, 1, 1], [], []>} : vector<16x16xbf16>, vector<16x128xbf16>, vector<16x128xf32> -> vector<16x128xf32>
    %c0_5 = arith.constant 0 : index
    %7 = memref.load %arg2[%c0_5] : memref<1xf32, #tpu.memory_space<smem>>
    %c0_6 = arith.constant 0 : index
    %c0_7 = arith.constant 0 : index
    %8 = vector.load %arg6[%c0_6, %c0_7] : memref<1x128xf32, #tpu.memory_space<vmem>>, vector<1x128xf32>
    %9 = vector.broadcast %8 : vector<1x128xf32> to vector<16x128xf32>
    %10 = arith.addf %6, %9 : vector<16x128xf32>
    %cst_8 = arith.constant 0.000000e+00 : f32
    %11 = vector.broadcast %cst_8 : f32 to vector<16x128xf32>
    %12 = arith.cmpf ogt, %10, %11 : vector<16x128xf32>
    %13 = vector.broadcast %7 : f32 to vector<16x128xf32>
    %14 = arith.mulf %13, %10 : vector<16x128xf32>
    %15 = arith.select %12, %10, %14 : vector<16x128xi1>, vector<16x128xf32>
    %c0_9 = arith.constant 0 : index
    %c0_10 = arith.constant 0 : index
    %c0_11 = arith.constant 0 : index
    %16 = vector.load %arg7[%c0_9, %c0_10, %c0_11] : memref<1x16x128xf32, #tpu.memory_space<vmem>>, vector<1x16x128xf32>
    %17 = vector.shape_cast %16 : vector<1x16x128xf32> to vector<16x128xf32>
    %18 = vector.shape_cast %15 : vector<16x128xf32> to vector<1x16x128xf32>
    tpu.vector_store %arg7[%c0_9, %c0_10, %c0_11], %18 {strides = array<i32>} : memref<1x16x128xf32, #tpu.memory_space<vmem>>, vector<1x16x128xf32>,
    return
  }
  func.func @transform_0(%arg0: i32, %arg1: i32) -> i32 {
    %c0_i32 = arith.constant 0 : i32
    %c0_i32_0 = arith.constant 0 : i32
    return %c0_i32 : i32
  }
  func.func @transform_1(%arg0: i32, %arg1: i32) -> (i32, i32, i32) {
    %c0_i32 = arith.constant 0 : i32
    %c0_i32_0 = arith.constant 0 : i32
    %c0_i32_1 = arith.constant 0 : i32
    return %arg0, %c0_i32, %c0_i32_0 : i32, i32, i32
  }
  func.func @transform_2(%arg0: i32, %arg1: i32) -> (i32, i32, i32) {
    %c0_i32 = arith.constant 0 : i32
    %c0_i32_0 = arith.constant 0 : i32
    return %arg0, %arg1, %c0_i32 : i32, i32, i32
  }
  func.func @transform_3(%arg0: i32, %arg1: i32) -> (i32, i32) {
    %c0_i32 = arith.constant 0 : i32
    %c0_i32_0 = arith.constant 0 : i32
    %c0_i32_1 = arith.constant 0 : i32
    return %c0_i32, %c0_i32_0 : i32, i32
  }
  func.func @transform_4(%arg0: i32, %arg1: i32) -> (i32, i32) {
    %c0_i32 = arith.constant 0 : i32
    %c0_i32_0 = arith.constant 0 : i32
    %c0_i32_1 = arith.constant 0 : i32
    return %c0_i32, %c0_i32_0 : i32, i32
  }
  func.func @transform_5(%arg0: i32, %arg1: i32) -> (i32, i32, i32) {
    %c0_i32 = arith.constant 0 : i32
    %c0_i32_0 = arith.constant 0 : i32
    return %arg0, %arg1, %c0_i32 : i32, i32, i32
  }
}

module attributes {stable_mosaic.version = 11 : i64} {
  func.func @_gcn_fused_kernel(%arg0: i32, %arg1: i32, %arg2: memref<1xf32, #tpu.memory_space<smem>>, %arg3: memref<1x16x128xbf16, #tpu.memory_space<vmem>>, %arg4: memref<1x16x16xbf16, #tpu.memory_space<vmem>>, %arg5: memref<128x128xbf16, #tpu.memory_space<vmem>>, %arg6: memref<1x128xf32, #tpu.memory_space<vmem>>, %arg7: memref<1x16x128xf32, #tpu.memory_space<vmem>>, %arg8: memref<16x128xbf16, #tpu.memory_space<vmem>>) attributes {dimension_semantics = [#tpu.dimension_semantics<parallel>, #tpu.dimension_semantics<arbitrary>], iteration_bounds = array<i64: 2, 1>, scalar_prefetch = 0 : i64, scratch_operands = 1 : i64, tpu.core_type = #tpu.core_type<tc>, window_params = [{transform_indices = @transform_0, window_bounds = array<i64: 1>}, {transform_indices = @transform_1, window_bounds = array<i64: 1, 16, 128>}, {transform_indices = @transform_2, window_bounds = array<i64: 1, 16, 16>}, {pipeline_mode = #tpu.pipeline_mode<synchronous>, transform_indices = @transform_3, window_bounds = array<i64: 128, 128>}, {pipeline_mode = #tpu.pipeline_mode<synchronous>, transform_indices = @transform_4, window_bounds = array<i64: 1, 128>}, {transform_indices = @transform_5, window_bounds = array<i64: 1, 16, 128>}]} {
    %c0_i32 = arith.constant 0 : i32
    %0 = arith.cmpi eq, %arg1, %c0_i32 : i32
    %1 = arith.extui %0 : i1 to i32
    %c0_i32_0 = arith.constant 0 : i32
    %2 = arith.cmpi ne, %1, %c0_i32_0 : i32
    scf.if %2 {
      %c0_12 = arith.constant 0 : index
      %c0_13 = arith.constant 0 : index
      %c0_14 = arith.constant 0 : index
      %19 = vector.load %arg3[%c0_12, %c0_13, %c0_14] : memref<1x16x128xbf16, #tpu.memory_space<vmem>>, vector<1x16x128xbf16>
      %20 = vector.shape_cast %19 : vector<1x16x128xbf16> to vector<16x128xbf16>
      %c0_15 = arith.constant 0 : index
      %c0_16 = arith.constant 0 : index
      %21 = vector.load %arg5[%c0_15, %c0_16] : memref<128x128xbf16, #tpu.memory_space<vmem>>, vector<128x128xbf16>
      %cst_17 = arith.constant dense<0.000000e+00> : vector<16x128xf32>
      %22 = tpu.matmul %20, %21, %cst_17 {dimension_numbers = #tpu.dot_dimension_numbers<[1], [0], [0], [1], [0, 0, 1, 1], [], []>} : vector<16x128xbf16>, vector<128x128xbf16>, vector<16x128xf32> -> vector<16x128xf32>
      %23 = arith.truncf %22 : vector<16x128xf32> to vector<16x128xbf16>
      %c0_18 = arith.constant 0 : index
      %c0_19 = arith.constant 0 : index
      %24 = vector.load %arg8[%c0_18, %c0_19] : memref<16x128xbf16, #tpu.memory_space<vmem>>, vector<16x128xbf16>
      tpu.vector_store %arg8[%c0_18, %c0_19], %23 {strides = array<i32>} : memref<16x128xbf16, #tpu.memory_space<vmem>>, vector<16x128xbf16>,
    } else {
    }
    %c0 = arith.constant 0 : index
    %c0_1 = arith.constant 0 : index
    %c0_2 = arith.constant 0 : index
    %3 = vector.load %arg4[%c0, %c0_1, %c0_2] : memref<1x16x16xbf16, #tpu.memory_space<vmem>>, vector<1x16x16xbf16>
    %4 = vector.shape_cast %3 : vector<1x16x16xbf16> to vector<16x16xbf16>
    %c0_3 = arith.constant 0 : index
    %c0_4 = arith.constant 0 : index
    %5 = vector.load %arg8[%c0_3, %c0_4] : memref<16x128xbf16, #tpu.memory_space<vmem>>, vector<16x128xbf16>
    %cst = arith.constant dense<0.000000e+00> : vector<16x128xf32>
    %6 = tpu.matmul %4, %5, %cst {dimension_numbers = #tpu.dot_dimension_numbers<[1], [0], [0], [1], [0, 0, 1, 1], [], []>} : vector<16x16xbf16>, vector<16x128xbf16>, vector<16x128xf32> -> vector<16x128xf32>
    %c0_5 = arith.constant 0 : index
    %7 = memref.load %arg2[%c0_5] : memref<1xf32, #tpu.memory_space<smem>>
    %c0_6 = arith.constant 0 : index
    %c0_7 = arith.constant 0 : index
    %8 = vector.load %arg6[%c0_6, %c0_7] : memref<1x128xf32, #tpu.memory_space<vmem>>, vector<1x128xf32>
    %9 = vector.broadcast %8 : vector<1x128xf32> to vector<16x128xf32>
    %10 = arith.addf %6, %9 : vector<16x128xf32>
    %cst_8 = arith.constant 0.000000e+00 : f32
    %11 = vector.broadcast %cst_8 : f32 to vector<16x128xf32>
    %12 = arith.cmpf ogt, %10, %11 : vector<16x128xf32>
    %13 = vector.broadcast %7 : f32 to vector<16x128xf32>
    %14 = arith.mulf %13, %10 : vector<16x128xf32>
    %15 = arith.select %12, %10, %14 : vector<16x128xi1>, vector<16x128xf32>
    %c0_9 = arith.constant 0 : index
    %c0_10 = arith.constant 0 : index
    %c0_11 = arith.constant 0 : index
    %16 = vector.load %arg7[%c0_9, %c0_10, %c0_11] : memref<1x16x128xf32, #tpu.memory_space<vmem>>, vector<1x16x128xf32>
    %17 = vector.shape_cast %16 : vector<1x16x128xf32> to vector<16x128xf32>
    %18 = vector.shape_cast %15 : vector<16x128xf32> to vector<1x16x128xf32>
    tpu.vector_store %arg7[%c0_9, %c0_10, %c0_11], %18 {strides = array<i32>} : memref<1x16x128xf32, #tpu.memory_space<vmem>>, vector<1x16x128xf32>,
    return
  }
  func.func @transform_0(%arg0: i32, %arg1: i32) -> i32 {
    %c0_i32 = arith.constant 0 : i32
    %c0_i32_0 = arith.constant 0 : i32
    return %c0_i32 : i32
  }
  func.func @transform_1(%arg0: i32, %arg1: i32) -> (i32, i32, i32) {
    %c0_i32 = arith.constant 0 : i32
    %c0_i32_0 = arith.constant 0 : i32
    %c0_i32_1 = arith.constant 0 : i32
    return %arg0, %c0_i32, %c0_i32_0 : i32, i32, i32
  }
  func.func @transform_2(%arg0: i32, %arg1: i32) -> (i32, i32, i32) {
    %c0_i32 = arith.constant 0 : i32
    %c0_i32_0 = arith.constant 0 : i32
    return %arg0, %arg1, %c0_i32 : i32, i32, i32
  }
  func.func @transform_3(%arg0: i32, %arg1: i32) -> (i32, i32) {
    %c0_i32 = arith.constant 0 : i32
    %c0_i32_0 = arith.constant 0 : i32
    %c0_i32_1 = arith.constant 0 : i32
    return %c0_i32, %c0_i32_0 : i32, i32
  }
  func.func @transform_4(%arg0: i32, %arg1: i32) -> (i32, i32) {
    %c0_i32 = arith.constant 0 : i32
    %c0_i32_0 = arith.constant 0 : i32
    %c0_i32_1 = arith.constant 0 : i32
    return %c0_i32, %c0_i32_0 : i32, i32
  }
  func.func @transform_5(%arg0: i32, %arg1: i32) -> (i32, i32, i32) {
    %c0_i32 = arith.constant 0 : i32
    %c0_i32_0 = arith.constant 0 : i32
    return %arg0, %arg1, %c0_i32 : i32, i32, i32
  }
}

</mosaic_0001>

<bundles_post_ra>
// kernel: tpu_custom_call.1
= control target key start
LH: loop header
LB: loop body
LE: loop exit
PB: predicated region body
PF: predicated region fallthrough
CT: control target
= control target key end

     0   :  { %s1273_s0 = inlined_call_operand.<no memory space> [shape: f32[1], index: 0, kind: input, shape index: {}]   ;;  %s1274_s1 = inlined_call_operand.hbm [shape: bf16[2,16,128], index: 1, kind: input, shape index: {}]   ;;  %s1275_s2 = inlined_call_operand.hbm [shape: bf16[2,16,16], index: 2, kind: input, shape index: {}]   ;;  %s1276_s3 = inlined_call_operand.hbm [shape: bf16[128,128], index: 3, kind: input, shape index: {}]   ;;  %s1277_s4 = inlined_call_operand.vmem [shape: f32[1,128], index: 4, kind: input, shape index: {}]   ;;  %s1278_s5 = inlined_call_operand.hbm [shape: f32[2,16,128], index: 5, kind: output, shape index: {}]  }
   0x1   :  { %10 = sst [smem:[#allocation3]] %s1273_s0 }
   0x2   :  { %11 = vsyncpa [#allocation5], 0 }
   0x3   :  { %12 = vsyncpa [#allocation8], 0 }
   0x4   :  { %14 = vsyncpa [#allocation8 + $0x1], 0 }
   0x5   :  { %15 = vsyncpa [#allocation6], 0 }
   0x6   :  { %17 = vsyncpa [#allocation6 + $0x1], 0  ;;  %s1006_s20 = smov 0   ;;  %s1008_s21 = smov 0  }
   0x7   :  { %s1010_s22 = smov 0   ;;  %s1012_s23 = smov 0  }
   0x8   :  { %s1014_s24 = smov 0   ;;  %s1016_s25 = smov 0  }
   0x9 LB: > { %s1037_s0 = sadd.s32 4294967295, %s961_s25   ;;  %s618_s26 = sadd.s32 4294967294, %s961_s25   ;;  %s961_s25 = sphi %s1016_s25, %s23_s25   ;;  %s957_s24 = sphi %s1014_s24, %s1311_s24   ;;  %s953_s23 = sphi %s1012_s23, %s1310_s23   ;;  %s949_s22 = sphi %s1010_s22, %s1309_s22   ;;  %s945_s21 = sphi %s1008_s21, %s1308_s21   ;;  %s941_s20 = sphi %s1006_s20, %s1307_s20  }
   0xa   : > { %p76_p0 = scmp.ne.s32.totalorder %s945_s21, %s941_s20  ;;  %p1279_p1 = scmp.eq.s32.totalorder %s1037_s0, 0 }
   0xb   : > { %p98_p2 = scmp.ne.s32.totalorder %s949_s22, %s945_s21  ;;  %p99_p3 = scmp.eq.s32.totalorder %s961_s25, 0 }
   0xc   : > { %p1048_p4 = por %p1279_p1, %p76_p0  ;;  %p172_p5 = scmp.eq.s32.totalorder %s1037_s0, 1 }
   0xd   : > { %p1053_p6 = por %p99_p3, %p98_p2  ;;  %p178_p7 = scmp.eq.s32.totalorder %s618_s26, 1 }
   0xe   : > { %s1288_s27 = scalar_select %p1048_p4, 1, 0 }
   0xf   : > { %p1057_p8 = por %p172_p5, %p98_p2  ;;  %p619_p9 = scmp.ge.s32.totalorder %s961_s25, 1 }
  0x10   : > { %p1062_p10 = por %p178_p7, %p76_p0  ;;  %p185_p11 = scmp.lt.s32.totalorder %s961_s25, 3 }
  0x11   : > { %s1290_s29 = scalar_select %p1057_p8, 1, 0 }
  0x12   : > { %s1291_s30 = scalar_select %p1062_p10, 1, 0 }
  0x13   : > { %p1067_p12 = pnand %p619_p9, %p185_p11  ;;  %s963_s7 = smov [#allocation9]  }
  0x14   : > { %s216_s8 = sshll.u32 %s963_s7, 4  ;;  %p714_p2 = scmp.lt.s32.totalorder %s961_s25, 2  ;;  %s217_s8 = int_to_ptr.vmem [resolvable:$true] %s216_s8 }
  0x15   : > { %s1292_s6 = scalar_select %p1067_p12, 1, 0 }
  0x16   : > { %p698_p3 = pneg %p1067_p12  ;;  %p1089_p7 = pnand %p714_p2, %p1053_p6 }
  0x17   : > { %s783_s14 = scalar_lea.hbm %s1276_s3, 1024 }
  0x18   : > { %p1077_p5 = pnand %p698_p3, %p1048_p4  ;;  %p1083_p0 = pnand %p698_p3, %p1279_p1 }
  0x19   : > { %s1295_s11 = scalar_select %p1089_p7, 1, 0 }
  0x1a   : > { %s1293_s9 = scalar_select %p1077_p5, 1, 0 }
  0x1b   : > { %p784_p9 = scmp.ne.s32.totalorder %s1276_s3, %s783_s14  ;;  %p785_p11 = pneg %p1083_p0 }
  0x1c   : > { %p790_p1 = scmp.lt.u32.totalorder %s783_s14, %s1276_s3 }
  0x1d   : > { %p786_p3 = pnand %p785_p11, %p784_p9 }
  0x1f   : > { %p787_p13 = pneg %p786_p3 }
  0x21   : > { %p792_p6 = pnand %p790_p1, %p787_p13 }
  0x23   : > { %795 = shalt.err (!%p792_p6)
}
  0x24   : > { %s796_s19 = scalar_lea.vmem %s217_s8, 1024  ;;  %p804_p4 = scmp.lt.s32.totalorder %s217_s8, %s217_s8 }
  0x25   : > { %p797_p2 = scmp.ne.s32.totalorder %s217_s8, %s796_s19  ;;  %p805_p12 = scmp.lt.s32.totalorder %s796_s19, %s796_s19 }
  0x27   : > { %p799_p10 = pnand %p797_p2, %p785_p11  ;;  %p806_p7 = por %p805_p12, %p804_p4 }
  0x29   : > { %p800_p8 = pneg %p799_p10 }
  0x2b   : > { %p807_p5 = pnand %p806_p7, %p800_p8 }
  0x2d   : > { %810 = shalt.err (!%p807_p5)
}
  0x2e   : > { %s1286_s26 = smov 64   ;;  %s1287_s28 = smov 4  }
  0x2f   : > { %704 = dma.hbm_to_vmem [thread:$0]  (!%p1083_p0), %s1276_s3, 1024, %s217_s8, [#allocation8], %s1286_s26, %s1286_s26, %s1287_s28  }
  0x30   : > { %s648_s13 = sshll.u32 %s953_s23, 7  ;;  %s966_s17 = smov [#allocation4]  }
  0x31   : > { %s1116_s16 = scalar_lea.hbm %s1274_s1, %s648_s13  ;;  %s203_s18 = sshll.u32 %s966_s17, 4  ;;  %s204_s18 = int_to_ptr.vmem [resolvable:$true] %s203_s18 }
  0x32   : > { %s811_s10 = scalar_lea.hbm %s1116_s16, 128  ;;  %p1296_p4 = scmp.ne.s32.totalorder %s1293_s9, 0 }
  0x33   : > { %p812_p1 = scmp.ne.s32.totalorder %s1116_s16, %s811_s10  ;;  %s816_s7 = scalar_lea.hbm %s1274_s1, 256 }
  0x34   : > { %p813_p8 = pneg %p1296_p4  ;;  %p817_p13 = scmp.lt.u32.totalorder %s1116_s16, %s1274_s1 }
  0x35   : > { %p818_p5 = scmp.lt.u32.totalorder %s816_s7, %s811_s10  ;;  %p820_p7 = scmp.lt.u32.totalorder %s811_s10, %s1116_s16 }
  0x36   : > { %p814_p10 = pnand %p813_p8, %p812_p1 }
  0x37   : > { %p819_p0 = por %p818_p5, %p817_p13 }
  0x38   : > { %p815_p12 = pneg %p814_p10 }
  0x39   : > { %p821_p9 = por %p820_p7, %p819_p0 }
  0x3b   : > { %p822_p11 = pnand %p821_p9, %p815_p12 }
  0x3d   : > { %825 = shalt.err (!%p822_p11)
}
  0x3e   : > { %s826_s14 = scalar_lea.vmem %s204_s18, 128  ;;  %p834_p1 = scmp.lt.s32.totalorder %s204_s18, %s204_s18 }
  0x3f   : > { %p827_p3 = scmp.ne.s32.totalorder %s204_s18, %s826_s14  ;;  %p835_p10 = scmp.lt.s32.totalorder %s826_s14, %s826_s14 }
  0x41   : > { %p829_p6 = pnand %p827_p3, %p813_p8  ;;  %p836_p5 = por %p835_p10, %p834_p1 }
  0x43   : > { %p830_p2 = pneg %p829_p6 }
  0x45   : > { %p837_p13 = pnand %p836_p5, %p830_p2 }
  0x47   : > { %840 = shalt.err (!%p837_p13)
}
  0x48   : > { %701 = dma.hbm_to_vmem [thread:$0]  (!%p1296_p4), %s1116_s16, 128, %s204_s18, [#allocation5], %s1286_s26, %s1286_s26, %s1287_s28  }
  0x49   : > { %s63_s15 = sadd.s32 1, %s949_s22  ;;  %s35_s17 = sadd.s32 1, %s957_s24 }
  0x4a   : > { %s233_s10 = sand.u32 1, %s961_s25   ;;  %p37_p8 = scmp.ge.s32.totalorder %s35_s17, 2 }
  0x4b   : > { %s235_s8 = sand.u32 1, %s949_s22   ;;  %s649_s9 = sshll.u32 %s957_s24, 7 }
  0x4c   : > { %s1313_s17 = smov (%p37_p8, %s35_s17), 0  ;;  %s624_s19 = sshll.u32 %s235_s8, 3 }
  0x4d   : > { %s1152_s13 = scalar_lea.hbm %s1275_s2, %s649_s9  ;;  %s60_s16 = ssub.s32 %s957_s24, %s1313_s17 }
  0x4e   : > { %p61_p4 = scmp.eq.s32.totalorder %s60_s16, 0  ;;  %s237_s18 = scalar_lea.vmem [#allocation7], %s624_s19 }
  0x4f   : > { %s246_s14 = sshll.u32 %s237_s18, 4  ;;  %s1161_s28 = scalar_lea.sflag [#allocation8], %s233_s10  ;;  %s1156_s14 = int_to_ptr.vmem [resolvable:$true] %s246_s14 }
  0x50   : > { %s1159_s26 = scalar_select %p61_p4, %s949_s22, %s63_s15  }
  0x51   : > { %s841_s8 = scalar_lea.hbm %s1152_s13, 128  ;;  %p1297_p0 = scmp.ne.s32.totalorder %s1295_s11, 0 }
  0x52   : > { %p842_p12 = scmp.ne.s32.totalorder %s1152_s13, %s841_s8  ;;  %s846_s12 = scalar_lea.hbm %s1275_s2, 256 }
  0x53   : > { %p843_p7 = pneg %p1297_p0  ;;  %p847_p3 = scmp.lt.u32.totalorder %s1152_s13, %s1275_s2 }
  0x54   : > { %p848_p6 = scmp.lt.u32.totalorder %s846_s12, %s841_s8  ;;  %p850_p1 = scmp.lt.u32.totalorder %s841_s8, %s1152_s13 }
  0x55   : > { %p844_p9 = pnand %p843_p7, %p842_p12 }
  0x56   : > { %p849_p2 = por %p848_p6, %p847_p3 }
  0x57   : > { %p845_p11 = pneg %p844_p9 }
  0x58   : > { %p851_p10 = por %p850_p1, %p849_p2 }
  0x5a   : > { %p852_p5 = pnand %p851_p10, %p845_p11 }
  0x5c   : > { %855 = shalt.err (!%p852_p5)
}
  0x5d   : > { %s856_s15 = scalar_lea.vmem %s1156_s14, 128  ;;  %s967_s10 = smov [#allocation7]  }
  0x5e   : > { %p857_p13 = scmp.ne.s32.totalorder %s1156_s14, %s856_s15  ;;  %s861_s18 = sshll.u32 %s967_s10, 4  ;;  %s862_s18 = int_to_ptr.vmem [resolvable:$false] %s861_s18 }
  0x5f   : > { %s863_s9 = scalar_lea.vmem %s862_s18, 256  ;;  %p864_p12 = scmp.lt.s32.totalorder %s1156_s14, %s862_s18 }
  0x60   : > { %p859_p8 = pnand %p857_p13, %p843_p7  ;;  %p865_p9 = scmp.lt.s32.totalorder %s863_s9, %s856_s15 }
  0x62   : > { %p860_p4 = pneg %p859_p8  ;;  %p866_p3 = por %p865_p9, %p864_p12 }
  0x64   : > { %p867_p6 = pnand %p866_p3, %p860_p4 }
  0x66   : > { %870 = shalt.err (!%p867_p6)
}
  0x67   : > { %s1298_s8 = smov 4   ;;  %s1299_s7 = smov 64  }
  0x68   : > { %708 = dma.hbm_to_vmem [thread:$0]  (!%p1297_p0), %s1152_s13, 128, %s1156_s14, %s1161_s28, %s1299_s7, %s1299_s7, %s1298_s8  }
  0x69   : > { %p1300_p7 = scmp.ne.s32.totalorder %s1292_s6, 0 }
  0x6a   : > { %p1301_p11 = scmp.ne.s32.totalorder (!%p1300_p7), %s1288_s27, 0 }
  0x6b   : > { %258 = sbr.rel (%p1300_p7) target bundleno = 609 (0x261), region = 40 }
  0x72   : > { %924 = dma.done.wait (%p1301_p11), [#allocation5], 128  }
  0x73   : > { %926 = vsyncadd (%p1301_p11), [#allocation5], 4294967168  ;;  %s264_s11 = sand.u32 1, %s1037_s0   ;;  %s1200_s12 = sand.u32 1, %s945_s21  }
  0x74   : > { %s628_s19 = sshll.u32 %s1200_s12, 3  ;;  %s265_s16 = scalar_lea.sflag [#allocation8], %s264_s11 }
  0x75   : > { %s1203_s15 = scalar_lea.vmem [#allocation7], %s628_s19 }
  0x76   : > { %928 = dma.done.wait (%p1301_p11), %s265_s16, 128  }
  0x77   : > { %930 = vsyncadd (%p1301_p11), %s265_s16, 4294967168  ;;  %p1302_p0 = scmp.eq.s32.totalorder %s1037_s0, 0 }
  0x79   : > { %932 = dma.done.wait (%p1302_p0), [#allocation8], 1024   ;;  %p1303_p2 = pmov %p1302_p0 }
  0x7a   : > { %v968_v0 = vmov 0.0   ;;  %vm969_vm0 = vmmov 0   ;;  %v773_v1 = vld [vmem:[#allocation9] sm:$0xff]   ;;  %v774_v2 = vld [vmem:[#allocation9 + $0x8] sm:$0xff]   ;;  %v775_v3 = vld [vmem:[#allocation9 + $0x10] sm:$0xff]   ;;  %vm437_vm1 = vcmask 130048  }
  0x7b   : > { %934 = vsyncadd (%p1303_p2), [#allocation8], 4294966272  ;;  %662 = vmatprep.subr.bf16.mxu0 %v968_v0  ;;  %678 = vmatprep.mubr.msk.bf16.mxu0 %vm969_vm0, %v968_v0  ;;  %v776_v4 = vld [vmem:[#allocation9 + $0x18] sm:$0xff]   ;;  %v777_v5 = vld [vmem:[#allocation9 + $0x20] sm:$0xff]   ;;  %s424_s0 = sld [smem:[#allocation3]]  ;;  %s630_s27 = sshll.u32 %s1200_s12, 4 }
  0x7c   : > { %682 = vmatprep.subr.bf16.mxu1 %v968_v0  ;;  %684 = vmatprep.mubr.msk.bf16.mxu1 %vm969_vm0, %v968_v0  ;;  %v778_v6 = vld [vmem:[#allocation9 + $0x28] sm:$0xff]   ;;  %v779_v7 = vld [vmem:[#allocation9 + $0x30] sm:$0xff]   ;;  %v780_v8 = vld [vmem:[#allocation9 + $0x38] sm:$0xff]   ;;  %s298_s13 = scalar_lea.vmem [#allocation10], %s630_s27  ;;  %s650_s10 = sshll.u32 %s953_s23, 8 }
  0x7d   : > { %663 = vmatpush3.bf16.msra.mxu0 %v773_v1  ;;  %v781_v9 = vld [vmem:[#allocation4] sm:$0xff]   ;;  %v782_v15 = vld [vmem:[%s1203_s15] sm:$0xff]   ;;  %s507_s14 = sshll.u32 %s298_s13, 4  ;;  %s1224_s8 = scalar_lea.hbm %s1278_s5, %s650_s10  ;;  %s1219_s14 = int_to_ptr.vmem [resolvable:$true] %s507_s14 }
  0x7e   : > { %664 = vmatprep.subr.bf16.mxu0 %v968_v0  ;;  %v640_v16 = vld [vmem:[%s1277_s4] ss:$0 sm:$0xff]  ;;  %s492_s23 = scalar_lea.sflag [#allocation6], %s1200_s12  ;;  %s871_s7 = scalar_lea.vmem %s1219_s14, 256 }
  0x7f   : > { %p872_p1 = scmp.ne.s32.totalorder %s1219_s14, %s871_s7  ;;  %p1304_p10 = scmp.ne.s32.totalorder %s1290_s29, 0 }
  0x80   : > { %s970_s11 = smov [#allocation10]  }
  0x81   : > { %665 = vmatpush3.bf16.msra.mxu0 %v774_v2  ;;  %v484_v18 = vstv %s424_s0  ;;  %p873_p5 = pnand %p872_p1, %p1304_p10  ;;  %s875_s19 = sshll.u32 %s970_s11, 4  ;;  %s876_s19 = int_to_ptr.vmem [resolvable:$false] %s875_s19 }
  0x82   : > { %666 = vmatprep.subr.bf16.mxu0 %v968_v0  ;;  %s877_s16 = scalar_lea.vmem %s876_s19, 512  ;;  %p878_p8 = scmp.lt.s32.totalorder %s1219_s14, %s876_s19 }
  0x83   : > { %p874_p13 = pneg %p873_p5  ;;  %p879_p4 = scmp.lt.s32.totalorder %s877_s16, %s871_s7 }
  0x85   : > { %667 = vmatpush3.bf16.msra.mxu0 %v775_v3  ;;  %p880_p12 = por %p879_p4, %p878_p8 }
  0x86   : > { %668 = vmatprep.subr.bf16.mxu0 %v968_v0 }
  0x87   : > { %p881_p9 = pnand %p880_p12, %p874_p13 }
  0x89   : > { %669 = vmatpush3.bf16.msra.mxu0 %v776_v4 }
  0x8a   : > { %670 = vmatprep.subr.bf16.mxu0 %v968_v0 }
  0x8d   : > { %671 = vmatpush3.bf16.msra.mxu0 %v777_v5 }
  0x8e   : > { %672 = vmatprep.subr.bf16.mxu0 %v968_v0 }
  0x91   : > { %673 = vmatpush3.bf16.msra.mxu0 %v778_v6 }
  0x92   : > { %674 = vmatprep.subr.bf16.mxu0 %v968_v0 }
  0x95   : > { %675 = vmatpush3.bf16.msra.mxu0 %v779_v7 }
  0x96   : > { %676 = vmatprep.subr.bf16.mxu0 %v968_v0 }
  0x99   : > { %677 = vmatpush3.bf16.msra.mxu0 %v780_v8 }
  0x9c   : > { %679 = vmatmul.mubr.bf16.vlgmr.msra.gmra.mrb[0].mxu0 %v781_v9 }
 0x16f   : > { %v412_v10 = vpop.f32.mrb[0].mxu0 }
 0x170   : > { %v680_v11 = vpop.f32.mrb[1].mxu0 }
 0x171   : > { %v415_v12 = vpop.f32.mrb[2].mxu0 }
 0x172   : > { %v419_v13 = vpack.c.bf16 %v415_v12, %v412_v10  ;;  %v681_v14 = vpop.f32.mrb[3].mxu0 }
 0x174   : > { %683 = vmatpush3.bf16.msra.mxu1 %v419_v13 }
 0x177   : > { %685 = vmatmul.mubr.msk.bf16.vlgmr.msra.gmra.mrb[0].mxu1 %vm437_vm1, %v782_v15 }
 0x24a   : > { %v475_v17 = vpop.f32.mrb[0].mxu1 }
 0x24b   : > { %v476_v19 = vadd.f32 %v640_v16, %v475_v17  ;;  %v686_v20 = vpop.f32.mrb[1].mxu1 }
 0x24c   : > { %v478_v21 = vpop.f32.mrb[2].mxu1 }
 0x24d   : > { %vm482_vm2 = vcmp.gt.f32.partialorder %v476_v19, 0.0  ;;  %v485_v22 = vmul.f32 %v484_v18, %v476_v19  ;;  %v479_v23 = vadd.f32 %v640_v16, %v478_v21  ;;  %v687_v24 = vpop.f32.mrb[3].mxu1 }
 0x24f   : > { %v487_v25 = vsel %vm482_vm2, %v476_v19, %v485_v22  ;;  %vm483_vm3 = vcmp.gt.f32.partialorder %v479_v23, 0.0  ;;  %v486_v26 = vmul.f32 %v484_v18, %v479_v23 }
 0x250   : > { %489 = vst [vmem:[%s298_s13] sm:$0xff] %v487_v25 }
 0x251   : > { %v488_v27 = vsel %vm483_vm3, %v479_v23, %v486_v26 }
 0x252   : > { %490 = vst [vmem:[%s298_s13 + $0x8] sm:$0xff] %v488_v27 }
 0x253   : > { %884 = shalt.err (!%p881_p9)
}
 0x254   : > { %s885_s15 = scalar_lea.hbm %s1224_s8, 256  ;;  %s889_s6 = scalar_lea.hbm %s1278_s5, 512 }
 0x255   : > { %p886_p3 = scmp.ne.s32.totalorder %s1224_s8, %s885_s15  ;;  %p890_p11 = scmp.lt.u32.totalorder %s1224_s8, %s1278_s5 }
 0x256   : > { %p891_p0 = scmp.lt.u32.totalorder %s889_s6, %s885_s15  ;;  %p893_p1 = scmp.lt.u32.totalorder %s885_s15, %s1224_s8 }
 0x257   : > { %p887_p6 = pnand %p886_p3, %p1304_p10 }
 0x258   : > { %p892_p2 = por %p891_p0, %p890_p11 }
 0x259   : > { %p888_p7 = pneg %p887_p6 }
 0x25a   : > { %p894_p5 = por %p893_p1, %p892_p2 }
 0x25c   : > { %p895_p13 = pnand %p894_p5, %p888_p7 }
 0x25e   : > { %898 = shalt.err (!%p895_p13)
}
 0x25f   : > { %s971_s10 = smov 128   ;;  %s972_s18 = smov 8  }
 0x260   : > { %696 = dma.vmem_to_hbm [thread:$0]  (%p1304_p10), %s1219_s14, 256, %s1224_s8, %s492_s23, %s971_s10, %s971_s10, %s972_s18  }
 0x261 PF: > { %s522_s9 = sand.u32 1, %s941_s20   ;;  %p1305_p8 = scmp.ne.s32.totalorder %s1291_s30, 0 }
 0x262   : > { %p1306_p4 = scmp.ge.s32.totalorder %s961_s25, 2  ;;  %s523_s7 = scalar_lea.sflag [#allocation6], %s522_s9 }
 0x264   : > { %p710_p12 = pnand %p1306_p4, %p1305_p8 }
 0x266   : > { %936 = dma.done.wait (!%p710_p12), %s523_s7, 256  }
 0x267   : > { %938 = vsyncadd (!%p710_p12), %s523_s7, 4294967040  ;;  %s23_s25 = sadd.s32 1, %s961_s25   ;;  %s1307_s20 = smov %s945_s21 }
 0x268   : > { %p20_p9 = scmp.ge.s32.totalorder %s23_s25, 4   ;;  %s1308_s21 = smov %s949_s22 }
 0x269   : > { %s1309_s22 = smov %s1159_s26  ;;  %s1310_s23 = smov %s957_s24 }
 0x26a   : > { %s1311_s24 = smov %s1313_s17  ;;  %22 = sbr.rel (!%p20_p9) target bundleno = 9 (0x9), region = 99 }
 0x271   :  { %528 = vsyncpa [#allocation5], 1 }
 0x272   :  { %530 = vsyncpa [#allocation5 + $0x1], 1 }
 0x273   :  { %531 = vsyncpa [#allocation8], 1 }
 0x274   :  { %533 = vsyncpa [#allocation8 + $0x1], 1 }
 0x275   :  { %534 = vsyncpa [#allocation6], 1 }
 0x276   :  { %536 = vsyncpa [#allocation6 + $0x1], 1 }

// kernel: tpu_custom_call.1
= control target key start
LH: loop header
LB: loop body
LE: loop exit
PB: predicated region body
PF: predicated region fallthrough
CT: control target
= control target key end

     0   :  { %s1309_s0 = inlined_call_operand.<no memory space> [shape: f32[1], index: 0, kind: input, shape index: {}]   ;;  %s1310_s1 = inlined_call_operand.hbm [shape: bf16[2,16,128], index: 1, kind: input, shape index: {}]   ;;  %s1311_s2 = inlined_call_operand.hbm [shape: bf16[2,16,16], index: 2, kind: input, shape index: {}]   ;;  %s1312_s3 = inlined_call_operand.hbm [shape: bf16[128,128], index: 3, kind: input, shape index: {}]   ;;  %s1313_s4 = inlined_call_operand.vmem [shape: f32[1,128], index: 4, kind: input, shape index: {}]   ;;  %s1314_s5 = inlined_call_operand.hbm [shape: f32[2,16,128], index: 5, kind: output, shape index: {}]  }
   0x1   :  { %1323 = sst [smem:[#allocation16_spill]] %s1310_s1 }
   0x2   :  { %1324 = sst [smem:[#allocation17_spill]] %s1312_s3 }
   0x3   :  { %10 = sst [smem:[#allocation3]] %s1309_s0 }
   0x4   :  { %11 = vsyncpa [#allocation5], 0 }
   0x5   :  { %13 = vsyncpa [#allocation5 + $0x1], 0 }
   0x6   :  { %14 = vsyncpa [#allocation8], 0 }
   0x7   :  { %16 = vsyncpa [#allocation8 + $0x1], 0 }
   0x8   :  { %17 = vsyncpa [#allocation6], 0 }
   0x9   :  { %19 = vsyncpa [#allocation6 + $0x1], 0  ;;  %s1033_s20 = smov 0   ;;  %s1035_s21 = smov 0  }
   0xa   :  { %s1037_s22 = smov 0   ;;  %s1039_s23 = smov 0  }
   0xb   :  { %s1041_s24 = smov 0   ;;  %s1043_s25 = smov 0  }
   0xc LB: > { %s1064_s0 = sadd.s32 4294967295, %s988_s25   ;;  %s644_s26 = sadd.s32 4294967294, %s988_s25   ;;  %s988_s25 = sphi %s1043_s25, %s25_s25   ;;  %s984_s24 = sphi %s1041_s24, %s1349_s24   ;;  %s980_s23 = sphi %s1039_s23, %s1348_s23   ;;  %s976_s22 = sphi %s1037_s22, %s1347_s22   ;;  %s972_s21 = sphi %s1035_s21, %s1346_s21   ;;  %s968_s20 = sphi %s1033_s20, %s1345_s20  }
   0xd   : > { %p78_p0 = scmp.ne.s32.totalorder %s972_s21, %s968_s20  ;;  %p1315_p1 = scmp.eq.s32.totalorder %s1064_s0, 0 }
   0xe   : > { %p180_p3 = scmp.eq.s32.totalorder %s644_s26, 1  ;;  %p645_p5 = scmp.ge.s32.totalorder %s988_s25, 1 }
   0xf   : > { %p1073_p4 = por %p1315_p1, %p78_p0  ;;  %p187_p7 = scmp.lt.s32.totalorder %s988_s25, 3 }
  0x10   : > { %p1078_p6 = por %p180_p3, %p78_p0  ;;  %s990_s30 = smov [#allocation9]  }
  0x11   : > { %s1325_s27 = scalar_select %p1073_p4, 1, 0 }
  0x12   : > { %s1326_s28 = scalar_select %p1078_p6, 1, 0 }
  0x13   : > { %p1083_p8 = pnand %p645_p5, %p187_p7  ;;  %s202_s6 = sshll.u32 %s990_s30, 4  ;;  %s203_s6 = int_to_ptr.vmem [resolvable:$true] %s202_s6 }
  0x14   : > { %s37_s8 = sadd.s32 1, %s984_s24  ;;  %s1329_s3 = sld [smem:[#allocation17_spill]] }
  0x15   : > { %s1327_s29 = scalar_select %p1083_p8, 1, 0 }
  0x16   : > { %p726_p9 = pneg %p1083_p8 }
  0x18   : > { %p1092_p11 = pnand %p726_p9, %p1315_p1 }
  0x1a   : > { %s810_s11 = scalar_lea.hbm %s1329_s3, 1024  ;;  %p812_p13 = pneg %p1092_p11 }
  0x1b   : > { %p811_p12 = scmp.ne.s32.totalorder %s1329_s3, %s810_s11  ;;  %p817_p5 = scmp.lt.u32.totalorder %s810_s11, %s1329_s3 }
  0x1d   : > { %p813_p0 = pnand %p812_p13, %p811_p12 }
  0x1f   : > { %p814_p3 = pneg %p813_p0 }
  0x21   : > { %p819_p7 = pnand %p817_p5, %p814_p3 }
  0x23   : > { %822 = shalt.err (!%p819_p7)
}
  0x24   : > { %s823_s16 = scalar_lea.vmem %s203_s6, 1024  ;;  %p831_p2 = scmp.lt.s32.totalorder %s203_s6, %s203_s6 }
  0x25   : > { %p824_p9 = scmp.ne.s32.totalorder %s203_s6, %s823_s16  ;;  %p832_p6 = scmp.lt.s32.totalorder %s823_s16, %s823_s16 }
  0x27   : > { %p826_p10 = pnand %p824_p9, %p812_p13  ;;  %p833_p4 = por %p832_p6, %p831_p2 }
  0x29   : > { %p827_p1 = pneg %p826_p10 }
  0x2b   : > { %p834_p8 = pnand %p833_p4, %p827_p1 }
  0x2d   : > { %837 = shalt.err (!%p834_p8)
}
  0x2e   : > { %s1318_s17 = smov 64   ;;  %s1320_s18 = smov 4  }
  0x2f   : > { %729 = dma.hbm_to_vmem [thread:$0]  (!%p1092_p11), %s1329_s3, 1024, %s203_s6, [#allocation8], %s1318_s17, %s1318_s17, %s1320_s18  }
  0x30   : > { %p39_p1 = scmp.ge.s32.totalorder %s37_s8, 2  ;;  %s65_s30 = sadd.s32 1, %s976_s22 }
  0x31   : > { %p72_p2 = scmp.ne.s32.totalorder %s976_s22, %s972_s21  ;;  %p73_p4 = scmp.eq.s32.totalorder %s988_s25, 0 }
  0x32   : > { %s1351_s8 = smov (%p39_p1, %s37_s8), 0  ;;  %p1332_p8 = scmp.eq.s32.totalorder %s1064_s0, 1 }
  0x33   : > { %1330 = sst [smem:[#allocation15_spill]] %s1351_s8  ;;  %p1122_p6 = por %p73_p4, %p72_p2 }
  0x34   : > { %p1128_p10 = por %p1332_p8, %p72_p2  ;;  %s62_s10 = ssub.s32 %s984_s24, %s1351_s8 }
  0x35   : > { %p742_p12 = scmp.lt.s32.totalorder %s988_s25, 2  ;;  %p63_p11 = scmp.eq.s32.totalorder %s62_s10, 0 }
  0x36   : > { %s219_s6 = sand.u32 1, %s976_s22   ;;  %s676_s13 = sshll.u32 %s984_s24, 7 }
  0x37   : > { %s648_s11 = sshll.u32 %s219_s6, 3  ;;  %s1334_s1 = sld [smem:[#allocation16_spill]] }
  0x38   : > { %s1137_s12 = scalar_select %p63_p11, %s976_s22, %s65_s30  }
  0x39   : > { %s223_s19 = scalar_lea.vmem [#allocation4], %s648_s11  ;;  %p1149_p13 = pnand %p742_p12, %p1122_p6 }
  0x3a   : > { %s230_s26 = sshll.u32 %s223_s19, 4  ;;  %s1156_s14 = scalar_lea.hbm %s1311_s2, %s676_s13  ;;  %s1145_s26 = int_to_ptr.vmem [resolvable:$true] %s230_s26 }
  0x3b   : > { %s244_s15 = scalar_lea.vmem [#allocation7], %s648_s11  ;;  %s1160_s3 = scalar_lea.sflag [#allocation5], %s219_s6 }
  0x3c   : > { %s1158_s18 = sshll.u32 %s244_s15, 4  ;;  %p840_p3 = pneg %p1149_p13  ;;  %s1192_s18 = int_to_ptr.vmem [resolvable:$true] %s1158_s18 }
  0x3d   : > { %s1143_s16 = scalar_lea.hbm %s1334_s1, %s676_s13  ;;  %s843_s17 = scalar_lea.hbm %s1334_s1, 256 }
  0x3e   : > { %s838_s19 = scalar_lea.hbm %s1143_s16, 128  ;;  %p844_p9 = scmp.lt.u32.totalorder %s1143_s16, %s1334_s1 }
  0x3f   : > { %p839_p0 = scmp.ne.s32.totalorder %s1143_s16, %s838_s19  ;;  %p845_p1 = scmp.lt.u32.totalorder %s843_s17, %s838_s19 }
  0x40   : > { %p847_p4 = scmp.lt.u32.totalorder %s838_s19, %s1143_s16 }
  0x41   : > { %p841_p5 = pnand %p840_p3, %p839_p0  ;;  %p846_p2 = por %p845_p1, %p844_p9 }
  0x43   : > { %p842_p7 = pneg %p841_p5  ;;  %p848_p6 = por %p847_p4, %p846_p2 }
  0x45   : > { %p849_p8 = pnand %p848_p6, %p842_p7 }
  0x47   : > { %852 = shalt.err (!%p849_p8)
}
  0x48   : > { %s853_s6 = scalar_lea.vmem %s1145_s26, 128  ;;  %s993_s8 = smov [#allocation4]  }
  0x49   : > { %p854_p12 = scmp.ne.s32.totalorder %s1145_s26, %s853_s6  ;;  %s858_s11 = sshll.u32 %s993_s8, 4  ;;  %s859_s11 = int_to_ptr.vmem [resolvable:$false] %s858_s11 }
  0x4a   : > { %s860_s15 = scalar_lea.vmem %s859_s11, 256  ;;  %p861_p5 = scmp.lt.s32.totalorder %s1145_s26, %s859_s11 }
  0x4b   : > { %p856_p11 = pnand %p854_p12, %p840_p3  ;;  %p862_p9 = scmp.lt.s32.totalorder %s860_s15, %s853_s6 }
  0x4d   : > { %p857_p0 = pneg %p856_p11  ;;  %p863_p1 = por %p862_p9, %p861_p5 }
  0x4f   : > { %p864_p2 = pnand %p863_p1, %p857_p0 }
  0x51   : > { %867 = shalt.err (!%p864_p2)
}
  0x52   : > { %s1336_s19 = smov 4   ;;  %s1337_s9 = smov 64  }
  0x53   : > { %733 = dma.hbm_to_vmem [thread:$0]  (!%p1149_p13), %s1143_s16, 128, %s1145_s26, %s1160_s3, %s1337_s9, %s1337_s9, %s1336_s19  }
  0x54   : > { %s240_s17 = sand.u32 1, %s988_s25   ;;  %s868_s13 = scalar_lea.hbm %s1156_s14, 128 }
  0x55   : > { %s1195_s30 = scalar_lea.sflag [#allocation8], %s240_s17  ;;  %p869_p7 = scmp.ne.s32.totalorder %s1156_s14, %s868_s13 }
  0x56   : > { %s873_s11 = scalar_lea.hbm %s1311_s2, 256  ;;  %p874_p8 = scmp.lt.u32.totalorder %s1156_s14, %s1311_s2 }
  0x57   : > { %p871_p4 = pnand %p869_p7, %p840_p3  ;;  %p875_p12 = scmp.lt.u32.totalorder %s873_s11, %s868_s13 }
  0x58   : > { %p877_p0 = scmp.lt.u32.totalorder %s868_s13, %s1156_s14 }
  0x59   : > { %p872_p6 = pneg %p871_p4  ;;  %p876_p11 = por %p875_p12, %p874_p8 }
  0x5b   : > { %p878_p5 = por %p877_p0, %p876_p11 }
  0x5d   : > { %p879_p9 = pnand %p878_p5, %p872_p6 }
  0x5f   : > { %882 = shalt.err (!%p879_p9)
}
  0x60   : > { %s883_s3 = scalar_lea.vmem %s1192_s18, 128  ;;  %s994_s16 = smov [#allocation7]  }
  0x61   : > { %p884_p1 = scmp.ne.s32.totalorder %s1192_s18, %s883_s3  ;;  %s888_s26 = sshll.u32 %s994_s16, 4  ;;  %s889_s26 = int_to_ptr.vmem [resolvable:$false] %s888_s26 }
  0x62   : > { %s890_s1 = scalar_lea.vmem %s889_s26, 256  ;;  %p891_p4 = scmp.lt.s32.totalorder %s1192_s18, %s889_s26 }
  0x63   : > { %p886_p2 = pnand %p884_p1, %p840_p3  ;;  %p892_p8 = scmp.lt.s32.totalorder %s890_s1, %s883_s3 }
  0x65   : > { %p887_p7 = pneg %p886_p2  ;;  %p893_p12 = por %p892_p8, %p891_p4 }
  0x67   : > { %p894_p11 = pnand %p893_p12, %p887_p7 }
  0x69   : > { %897 = shalt.err (!%p894_p11)
}
  0x6a   : > { %736 = dma.hbm_to_vmem [thread:$0]  (!%p1149_p13), %s1156_s14, 128, %s1192_s18, %s1195_s30, %s1337_s9, %s1337_s9, %s1336_s19  }
  0x6b   : > { %p1338_p3 = scmp.ne.s32.totalorder %s1327_s29, 0 }
  0x6c   : > { %s1227_s17 = sand.u32 (!%p1338_p3), 1, %s972_s21   ;;  %p1339_p6 = scmp.ne.s32.totalorder (!%p1338_p3), %s1325_s27, 0 }
  0x6d   : > { %265 = sbr.rel (%p1338_p3) target bundleno = 610 (0x262), region = 40  ;;  %s655_s13 = sshll.u32 (!%p1338_p3), %s1227_s17, 3 }
  0x6e   : > { %s268_s6 = scalar_lea.sflag (!%p1338_p3), [#allocation5], %s1227_s17  ;;  %s1231_s8 = scalar_lea.vmem (!%p1338_p3), [#allocation4], %s655_s13 }
  0x74   : > { %951 = dma.done.wait (%p1339_p6), %s268_s6, 128  }
  0x75   : > { %953 = vsyncadd (%p1339_p6), %s268_s6, 4294967168  ;;  %s276_s18 = sand.u32 1, %s1064_s0   ;;  %s1238_s10 = scalar_lea.vmem [#allocation7], %s655_s13 }
  0x76   : > { %s277_s29 = scalar_lea.sflag [#allocation8], %s276_s18 }
  0x77   : > { %955 = dma.done.wait (%p1339_p6), %s277_s29, 128  }
  0x78   : > { %957 = vsyncadd (%p1339_p6), %s277_s29, 4294967168  ;;  %p1340_p13 = scmp.eq.s32.totalorder %s1064_s0, 0 }
  0x7a   : > { %959 = dma.done.wait (%p1340_p13), [#allocation8], 1024   ;;  %p1341_p0 = pmov %p1340_p13 }
  0x7b   : > { %v995_v0 = vmov 0.0   ;;  %vm996_vm0 = vmmov 0   ;;  %v800_v1 = vld [vmem:[#allocation9] sm:$0xff]   ;;  %v801_v2 = vld [vmem:[#allocation9 + $0x8] sm:$0xff]   ;;  %v802_v3 = vld [vmem:[#allocation9 + $0x10] sm:$0xff]   ;;  %vm454_vm1 = vcmask 130048  }
  0x7c   : > { %961 = vsyncadd (%p1341_p0), [#allocation8], 4294966272  ;;  %690 = vmatprep.subr.bf16.mxu0 %v995_v0  ;;  %706 = vmatprep.mubr.msk.bf16.mxu0 %vm996_vm0, %v995_v0  ;;  %v803_v4 = vld [vmem:[#allocation9 + $0x18] sm:$0xff]   ;;  %v804_v5 = vld [vmem:[#allocation9 + $0x20] sm:$0xff]   ;;  %s441_s0 = sld [smem:[#allocation3]]  ;;  %s658_s27 = sshll.u32 %s1227_s17, 4 }
  0x7d   : > { %710 = vmatprep.subr.bf16.mxu1 %v995_v0  ;;  %712 = vmatprep.mubr.msk.bf16.mxu1 %vm996_vm0, %v995_v0  ;;  %v805_v6 = vld [vmem:[#allocation9 + $0x28] sm:$0xff]   ;;  %v806_v7 = vld [vmem:[#allocation9 + $0x30] sm:$0xff]   ;;  %v807_v8 = vld [vmem:[#allocation9 + $0x38] sm:$0xff]   ;;  %s315_s9 = scalar_lea.vmem [#allocation10], %s658_s27  ;;  %s678_s11 = sshll.u32 %s980_s23, 8 }
  0x7e   : > { %691 = vmatpush3.bf16.msra.mxu0 %v800_v1  ;;  %v808_v9 = vld [vmem:[%s1231_s8] sm:$0xff]   ;;  %v809_v15 = vld [vmem:[%s1238_s10] sm:$0xff]   ;;  %s524_s30 = sshll.u32 %s315_s9, 4  ;;  %s1260_s16 = scalar_lea.hbm %s1314_s5, %s678_s11  ;;  %s1255_s30 = int_to_ptr.vmem [resolvable:$true] %s524_s30 }
  0x7f   : > { %692 = vmatprep.subr.bf16.mxu0 %v995_v0  ;;  %v668_v16 = vld [vmem:[%s1313_s4] ss:$0 sm:$0xff]  ;;  %s509_s23 = scalar_lea.sflag [#allocation6], %s1227_s17  ;;  %s898_s26 = scalar_lea.vmem %s1255_s30, 256 }
  0x80   : > { %p899_p5 = scmp.ne.s32.totalorder %s1255_s30, %s898_s26  ;;  %s997_s1 = smov [#allocation10]  }
  0x81   : > { %s902_s13 = sshll.u32 %s997_s1, 4  ;;  %s903_s13 = int_to_ptr.vmem [resolvable:$false] %s902_s13 }
  0x82   : > { %693 = vmatpush3.bf16.msra.mxu0 %v801_v2  ;;  %v501_v18 = vstv %s441_s0  ;;  %p900_p9 = pnand %p899_p5, %p1128_p10  ;;  %s904_s6 = scalar_lea.vmem %s903_s13, 512 }
  0x83   : > { %694 = vmatprep.subr.bf16.mxu0 %v995_v0  ;;  %p905_p2 = scmp.lt.s32.totalorder %s1255_s30, %s903_s13  ;;  %p906_p7 = scmp.lt.s32.totalorder %s904_s6, %s898_s26 }
  0x84   : > { %p901_p1 = pneg %p900_p9 }
  0x85   : > { %p907_p4 = por %p906_p7, %p905_p2 }
  0x86   : > { %695 = vmatpush3.bf16.msra.mxu0 %v802_v3 }
  0x87   : > { %696 = vmatprep.subr.bf16.mxu0 %v995_v0  ;;  %p908_p8 = pnand %p907_p4, %p901_p1 }
  0x8a   : > { %697 = vmatpush3.bf16.msra.mxu0 %v803_v4 }
  0x8b   : > { %698 = vmatprep.subr.bf16.mxu0 %v995_v0 }
  0x8e   : > { %699 = vmatpush3.bf16.msra.mxu0 %v804_v5 }
  0x8f   : > { %700 = vmatprep.subr.bf16.mxu0 %v995_v0 }
  0x92   : > { %701 = vmatpush3.bf16.msra.mxu0 %v805_v6 }
  0x93   : > { %702 = vmatprep.subr.bf16.mxu0 %v995_v0 }
  0x96   : > { %703 = vmatpush3.bf16.msra.mxu0 %v806_v7 }
  0x97   : > { %704 = vmatprep.subr.bf16.mxu0 %v995_v0 }
  0x9a   : > { %705 = vmatpush3.bf16.msra.mxu0 %v807_v8 }
  0x9d   : > { %707 = vmatmul.mubr.bf16.vlgmr.msra.gmra.mrb[0].mxu0 %v808_v9 }
 0x170   : > { %v429_v10 = vpop.f32.mrb[0].mxu0 }
 0x171   : > { %v708_v11 = vpop.f32.mrb[1].mxu0 }
 0x172   : > { %v432_v12 = vpop.f32.mrb[2].mxu0 }
 0x173   : > { %v436_v13 = vpack.c.bf16 %v432_v12, %v429_v10  ;;  %v709_v14 = vpop.f32.mrb[3].mxu0 }
 0x175   : > { %711 = vmatpush3.bf16.msra.mxu1 %v436_v13 }
 0x178   : > { %713 = vmatmul.mubr.msk.bf16.vlgmr.msra.gmra.mrb[0].mxu1 %vm454_vm1, %v809_v15 }
 0x24b   : > { %v492_v17 = vpop.f32.mrb[0].mxu1 }
 0x24c   : > { %v493_v19 = vadd.f32 %v668_v16, %v492_v17  ;;  %v714_v20 = vpop.f32.mrb[1].mxu1 }
 0x24d   : > { %v495_v21 = vpop.f32.mrb[2].mxu1 }
 0x24e   : > { %vm499_vm2 = vcmp.gt.f32.partialorder %v493_v19, 0.0  ;;  %v502_v22 = vmul.f32 %v501_v18, %v493_v19  ;;  %v496_v23 = vadd.f32 %v668_v16, %v495_v21  ;;  %v715_v24 = vpop.f32.mrb[3].mxu1 }
 0x250   : > { %v504_v25 = vsel %vm499_vm2, %v493_v19, %v502_v22  ;;  %vm500_vm3 = vcmp.gt.f32.partialorder %v496_v23, 0.0  ;;  %v503_v26 = vmul.f32 %v501_v18, %v496_v23 }
 0x251   : > { %506 = vst [vmem:[%s315_s9] sm:$0xff] %v504_v25 }
 0x252   : > { %v505_v27 = vsel %vm500_vm3, %v496_v23, %v503_v26 }
 0x253   : > { %507 = vst [vmem:[%s315_s9 + $0x8] sm:$0xff] %v505_v27 }
 0x254   : > { %911 = shalt.err (!%p908_p8)
}
 0x255   : > { %s912_s8 = scalar_lea.hbm %s1260_s16, 256  ;;  %s916_s10 = scalar_lea.hbm %s1314_s5, 512 }
 0x256   : > { %p913_p12 = scmp.ne.s32.totalorder %s1260_s16, %s912_s8  ;;  %p917_p6 = scmp.lt.u32.totalorder %s1260_s16, %s1314_s5 }
 0x257   : > { %p918_p13 = scmp.lt.u32.totalorder %s916_s10, %s912_s8  ;;  %p920_p5 = scmp.lt.u32.totalorder %s912_s8, %s1260_s16 }
 0x258   : > { %p914_p11 = pnand %p913_p12, %p1128_p10 }
 0x259   : > { %p919_p0 = por %p918_p13, %p917_p6 }
 0x25a   : > { %p915_p3 = pneg %p914_p11 }
 0x25b   : > { %p921_p9 = por %p920_p5, %p919_p0 }
 0x25d   : > { %p922_p1 = pnand %p921_p9, %p915_p3 }
 0x25f   : > { %925 = shalt.err (!%p922_p1)
}
 0x260   : > { %s998_s14 = smov 128   ;;  %s999_s19 = smov 8  }
 0x261   : > { %724 = dma.vmem_to_hbm [thread:$0]  (%p1128_p10), %s1255_s30, 256, %s1260_s16, %s509_s23, %s998_s14, %s998_s14, %s999_s19  }
 0x262 PF: > { %s539_s9 = sand.u32 1, %s968_s20   ;;  %p1342_p2 = scmp.ne.s32.totalorder %s1326_s28, 0 }
 0x263   : > { %p1343_p7 = scmp.ge.s32.totalorder %s988_s25, 2  ;;  %s540_s11 = scalar_lea.sflag [#allocation6], %s539_s9 }
 0x265   : > { %p738_p4 = pnand %p1343_p7, %p1342_p2 }
 0x267   : > { %963 = dma.done.wait (!%p738_p4), %s540_s11, 256  }
 0x268   : > { %965 = vsyncadd (!%p738_p4), %s540_s11, 4294967040  ;;  %s25_s25 = sadd.s32 1, %s988_s25   ;;  %s1344_s7 = sld [smem:[#allocation15_spill]] }
 0x269   : > { %p22_p8 = scmp.ge.s32.totalorder %s25_s25, 4   ;;  %s1345_s20 = smov %s972_s21 }
 0x26a   : > { %s1346_s21 = smov %s976_s22  ;;  %s1347_s22 = smov %s1137_s12 }
 0x26b   : > { %s1348_s23 = smov %s984_s24  ;;  %24 = sbr.rel (!%p22_p8) target bundleno = 12 (0xc), region = 106 }
 0x26e   : > { %s1349_s24 = smov %s1344_s7 }
 0x272   :  { %545 = vsyncpa [#allocation5], 1 }
 0x273   :  { %547 = vsyncpa [#allocation5 + $0x1], 1 }
 0x274   :  { %548 = vsyncpa [#allocation8], 1 }
 0x275   :  { %550 = vsyncpa [#allocation8 + $0x1], 1 }
 0x276   :  { %551 = vsyncpa [#allocation6], 1 }
 0x277   :  { %553 = vsyncpa [#allocation6 + $0x1], 1 }

</bundles_post_ra>
